<compile_context>
chip_gen: v5e
topology: v5e:2x2
jax: 0.10.0
libtpu: 0.0.40
codegen_flags: <defaults>
</compile_context>

<pallas_src>
import functools

import jax
import jax.numpy as jnp
from jax.experimental import pallas as pl
from jax.experimental.pallas import tpu as pltpu


# ---------------------------------------------------------------------------
# Fused kernel: QKV projection + causal flash attention + output projection.
# ---------------------------------------------------------------------------
def _mha_flash_kernel(x_ref, q_ref, wk_ref, wq_ref, wv_ref, wp_ref, bp_ref,
                      o_ref,
                      qproj_scr, m_scr, l_scr, acc_scr,
                      *, num_heads, head_size, tq, tk, compute_dtype):
    qi = pl.program_id(1)
    ki = pl.program_id(2)
    n_kv = pl.num_programs(2)
    E = num_heads * head_size

    @pl.when(ki == 0)
    def _init():
        m_scr[...] = jnp.full((num_heads, tq, 1), -jnp.inf, jnp.float32)
        l_scr[...] = jnp.zeros((num_heads, tq, 1), jnp.float32)
        acc_scr[...] = jnp.zeros((tq, E), jnp.float32)
        # Fused Q projection for all heads at once (computed once per q tile).
        q_in = q_ref[0].astype(compute_dtype)                       # (tq, C)
        qproj_scr[...] = jnp.dot(q_in, wq_ref[...].astype(compute_dtype),
                                 preferred_element_type=jnp.float32)  # (tq, E)

    # Skip KV tiles that lie entirely above the causal diagonal.
    @pl.when(ki * tk < (qi + 1) * tq)
    def _compute():
        x_kv = x_ref[0].astype(compute_dtype)                       # (tk, C)
        # Fused K / V projections for all heads (E-wide MXU matmuls).
        k = jnp.dot(x_kv, wk_ref[...].astype(compute_dtype),
                    preferred_element_type=jnp.float32)             # (tk, E)
        v = jnp.dot(x_kv, wv_ref[...].astype(compute_dtype),
                    preferred_element_type=jnp.float32)             # (tk, E)

        # Causal mask in global coordinates (hoisted out of the head loop).
        row = qi * tq + jax.lax.broadcasted_iota(jnp.int32, (tq, tk), 0)
        col = ki * tk + jax.lax.broadcasted_iota(jnp.int32, (tq, tk), 1)
        causal = col <= row

        for h in range(num_heads):                 # static unrolled head loop
            sl = slice(h * head_size, (h + 1) * head_size)
            qh = qproj_scr[:, sl].astype(compute_dtype)             # (tq, H)
            kh = k[:, sl].astype(compute_dtype)                     # (tk, H)
            vh = v[:, sl].astype(compute_dtype)                     # (tk, H)

            # q @ k^T without materializing a transpose of k.
            s = jax.lax.dot_general(qh, kh, (((1,), (1,)), ((), ())),
                                    preferred_element_type=jnp.float32)
            s = jnp.where(causal, s, -jnp.inf)                      # (tq, tk)

            m_old = m_scr[h]                                        # (tq, 1)
            m_new = jnp.maximum(m_old, jnp.max(s, axis=-1, keepdims=True))
            alpha = jnp.exp(m_old - m_new)
            p = jnp.exp(s - m_new)
            # TODO(synk): attention dropout omitted (eval mode -> identity).
            l_scr[h] = alpha * l_scr[h] + jnp.sum(p, axis=-1, keepdims=True)
            acc_scr[:, sl] = alpha * acc_scr[:, sl] + jnp.dot(
                p.astype(compute_dtype), vh,
                preferred_element_type=jnp.float32)
            m_scr[h] = m_new

    @pl.when(ki == n_kv - 1)
    def _finalize():
        # Normalize per head, then fused output projection + bias.
        for h in range(num_heads):
            sl = slice(h * head_size, (h + 1) * head_size)
            inv = pl.reciprocal(l_scr[h], approx=True)              # (tq, 1)
            acc_scr[:, sl] = acc_scr[:, sl] * inv
        attn = acc_scr[...].astype(compute_dtype)                   # (tq, E)
        y = jnp.dot(attn, wp_ref[...].astype(compute_dtype),
                    preferred_element_type=jnp.float32) + bp_ref[...]
        # TODO(synk): output dropout omitted (eval mode -> identity).
        o_ref[0] = y.astype(o_ref.dtype)                            # lane-dense (tq, E)


def multihead_attention_fused(x, q, wk, wq, wv, wp, bp, *,
                              num_heads, head_size,
                              seq_block=128,
                              compute_dtype=jnp.float32):
    """x, q: (B, T, C); wk/wq/wv: (C, E); wp: (E, E); bp: (1, E) -> (B, T, E)."""
    B, T, C = x.shape
    E = num_heads * head_size
    assert wk.shape == (C, E) and wq.shape == (C, E) and wv.shape == (C, E)
    assert wp.shape == (E, E) and bp.shape == (1, E)

    blk = seq_block if (T % seq_block == 0) else T   # full-dim block if T small
    n_q = T // blk
    n_kv = T // blk

    kernel = functools.partial(
        _mha_flash_kernel,
        num_heads=num_heads, head_size=head_size,
        tq=blk, tk=blk, compute_dtype=compute_dtype)

    x_spec = pl.BlockSpec((1, blk, C), lambda b, qi, ki: (b, ki, 0))
    q_spec = pl.BlockSpec((1, blk, C), lambda b, qi, ki: (b, qi, 0))
    w_spec = pl.BlockSpec((C, E), lambda b, qi, ki: (0, 0))
    wp_spec = pl.BlockSpec((E, E), lambda b, qi, ki: (0, 0))
    bp_spec = pl.BlockSpec((1, E), lambda b, qi, ki: (0, 0))
    out_spec = pl.BlockSpec((1, blk, E), lambda b, qi, ki: (b, qi, 0))

    return pl.pallas_call(
        kernel,
        out_shape=jax.ShapeDtypeStruct((B, T, E), x.dtype),
        grid_spec=pltpu.PrefetchScalarGridSpec(
            num_scalar_prefetch=0,
            grid=(B, n_q, n_kv),
            in_specs=[x_spec, q_spec, w_spec, w_spec, w_spec, wp_spec, bp_spec],
            out_specs=out_spec,
            scratch_shapes=[
                pltpu.VMEM((blk, E), jnp.float32),             # Q projection
                pltpu.VMEM((num_heads, blk, 1), jnp.float32),  # running max
                pltpu.VMEM((num_heads, blk, 1), jnp.float32),  # running sum
                pltpu.VMEM((blk, E), jnp.float32),             # output accumulator
            ]),
        compiler_params=pltpu.CompilerParams(
            dimension_semantics=("parallel", "parallel", "arbitrary"),
            vmem_limit_bytes=48 << 20),   # safe on v5e/v6e/v7x (< 64 MiB)
    )(x, q, wk, wq, wv, wp, bp)


# ---------------------------------------------------------------------------
# Module wrapper (weights stored fused & pre-transposed: y = x @ W [+ b])
# ---------------------------------------------------------------------------
class MultiHeadAttentionPallas:
    def __init__(self, head_size, num_heads, emb_dim, dropout, key,
                 compute_dtype=jnp.float32):
        assert head_size * num_heads == emb_dim, "concat dim must equal emb_dim"
        self.head_size = head_size
        self.num_heads = num_heads
        self.emb_dim = emb_dim
        # For large shapes, set compute_dtype=jnp.bfloat16 to hit MXU bf16 peak
        # (f32 accumulation kept via preferred_element_type).
        self.compute_dtype = compute_dtype
        k1, k2, k3, k4, k5 = jax.random.split(key, 5)
        s_in = 1.0 / jnp.sqrt(emb_dim)
        E = emb_dim
        # fused per-head projection weights, stored as (C, NH*H) (== W.T per head)
        self.wk = jax.random.uniform(k1, (emb_dim, E), jnp.float32, -s_in, s_in)
        self.wq = jax.random.uniform(k2, (emb_dim, E), jnp.float32, -s_in, s_in)
        self.wv = jax.random.uniform(k3, (emb_dim, E), jnp.float32, -s_in, s_in)
        # output projection (stored pre-transposed: y = x @ wp + bp)
        self.wp = jax.random.uniform(k4, (E, E), jnp.float32, -s_in, s_in)
        self.bp = jax.random.uniform(k5, (1, E), jnp.float32, -s_in, s_in)

    @functools.partial(jax.jit, static_argnums=0)
    def __call__(self, x, q=None):
        if q is None:          # matches the PyTorch `q is None` branch
            q = x
        return multihead_attention_fused(
            x, q, self.wk, self.wq, self.wv, self.wp, self.bp,
            num_heads=self.num_heads, head_size=self.head_size,
            compute_dtype=self.compute_dtype)


# ---------------------------------------------------------------------------
# Pure-JAX reference for sanity checking
# ---------------------------------------------------------------------------
def _reference(mha, x, q):
    B, T, C = x.shape
    H = mha.head_size
    outs = []
    for h in range(mha.num_heads):
        sl = slice(h * H, (h + 1) * H)
        k = x @ mha.wk[:, sl]
        qh = q @ mha.wq[:, sl]
        v = x @ mha.wv[:, sl]
        wei = qh @ jnp.swapaxes(k, -2, -1)
        mask = jnp.tril(jnp.ones((T, T), bool))
        wei = jnp.where(mask, wei, -jnp.inf)
        wei = jax.nn.softmax(wei, axis=-1)
        outs.append(wei @ v)
    cat = jnp.concatenate(outs, axis=-1)
    return cat @ mha.wp + mha.bp


if __name__ == "__main__":
    B, T = 2, 8
    emb_dim, num_heads = 32, 4
    head_size = emb_dim // num_heads

    key = jax.random.PRNGKey(0)
    kx, kq, kp = jax.random.split(key, 3)
    x = jax.random.normal(kx, (B, T, emb_dim), jnp.float32)
    q = jax.random.normal(kq, (B, T, emb_dim), jnp.float32)

    mha = MultiHeadAttentionPallas(head_size, num_heads, emb_dim,
                                   dropout=0.1, key=kp)

    out = jax.block_until_ready(mha(x, q))

    ref = _reference(mha, x, q)
    assert out.shape == (B, T, emb_dim)
    assert jnp.allclose(out, ref, atol=5e-3, rtol=5e-3), "mismatch vs reference"
    print("KERNEL_OK")
</pallas_src>

<mosaic_0001>
module attributes {stable_mosaic.version = 11 : i64} {
  func.func @_mha_flash_kernel(%arg0: i32, %arg1: i32, %arg2: i32, %arg3: memref<1x8x32xf32, #tpu.memory_space<vmem>>, %arg4: memref<1x8x32xf32, #tpu.memory_space<vmem>>, %arg5: memref<32x32xf32, #tpu.memory_space<vmem>>, %arg6: memref<32x32xf32, #tpu.memory_space<vmem>>, %arg7: memref<32x32xf32, #tpu.memory_space<vmem>>, %arg8: memref<32x32xf32, #tpu.memory_space<vmem>>, %arg9: memref<1x32xf32, #tpu.memory_space<vmem>>, %arg10: memref<1x8x32xf32, #tpu.memory_space<vmem>>, %arg11: memref<8x32xf32, #tpu.memory_space<vmem>>, %arg12: memref<4x8x1xf32, #tpu.memory_space<vmem>>, %arg13: memref<4x8x1xf32, #tpu.memory_space<vmem>>, %arg14: memref<8x32xf32, #tpu.memory_space<vmem>>) attributes {dimension_semantics = [#tpu.dimension_semantics<parallel>, #tpu.dimension_semantics<parallel>, #tpu.dimension_semantics<arbitrary>], iteration_bounds = array<i64: 2, 1, 1>, scalar_prefetch = 0 : i64, scratch_operands = 4 : i64, tpu.core_type = #tpu.core_type<tc>, window_params = [{transform_indices = @transform_0, window_bounds = array<i64: 1, 8, 32>}, {transform_indices = @transform_1, window_bounds = array<i64: 1, 8, 32>}, {pipeline_mode = #tpu.pipeline_mode<synchronous>, transform_indices = @transform_2, window_bounds = array<i64: 32, 32>}, {pipeline_mode = #tpu.pipeline_mode<synchronous>, transform_indices = @transform_3, window_bounds = array<i64: 32, 32>}, {pipeline_mode = #tpu.pipeline_mode<synchronous>, transform_indices = @transform_4, window_bounds = array<i64: 32, 32>}, {pipeline_mode = #tpu.pipeline_mode<synchronous>, transform_indices = @transform_5, window_bounds = array<i64: 32, 32>}, {pipeline_mode = #tpu.pipeline_mode<synchronous>, transform_indices = @transform_6, window_bounds = array<i64: 1, 32>}, {transform_indices = @transform_7, window_bounds = array<i64: 1, 8, 32>}]} {
    %c0_i32 = arith.constant 0 : i32
    %0 = arith.cmpi eq, %arg2, %c0_i32 : i32
    %1 = arith.extui %0 : i1 to i32
    %c0_i32_0 = arith.constant 0 : i32
    %2 = arith.cmpi ne, %1, %c0_i32_0 : i32
    scf.if %2 {
      %cst = arith.constant 0xFF800000 : f32
      %12 = vector.broadcast %cst : f32 to vector<4x8x1xf32>
      %c0 = arith.constant 0 : index
      %c0_5 = arith.constant 0 : index
      %c0_6 = arith.constant 0 : index
      %13 = vector.load %arg12[%c0, %c0_5, %c0_6] : memref<4x8x1xf32, #tpu.memory_space<vmem>>, vector<4x8x1xf32>
      tpu.vector_store %arg12[%c0, %c0_5, %c0_6], %12 {strides = array<i32>} : memref<4x8x1xf32, #tpu.memory_space<vmem>>, vector<4x8x1xf32>,
      %cst_7 = arith.constant 0.000000e+00 : f32
      %14 = vector.broadcast %cst_7 : f32 to vector<4x8x1xf32>
      %c0_8 = arith.constant 0 : index
      %c0_9 = arith.constant 0 : index
      %c0_10 = arith.constant 0 : index
      %15 = vector.load %arg13[%c0_8, %c0_9, %c0_10] : memref<4x8x1xf32, #tpu.memory_space<vmem>>, vector<4x8x1xf32>
      tpu.vector_store %arg13[%c0_8, %c0_9, %c0_10], %14 {strides = array<i32>} : memref<4x8x1xf32, #tpu.memory_space<vmem>>, vector<4x8x1xf32>,
      %cst_11 = arith.constant 0.000000e+00 : f32
      %16 = vector.broadcast %cst_11 : f32 to vector<8x32xf32>
      %c0_12 = arith.constant 0 : index
      %c0_13 = arith.constant 0 : index
      %17 = vector.load %arg14[%c0_12, %c0_13] : memref<8x32xf32, #tpu.memory_space<vmem>>, vector<8x32xf32>
      tpu.vector_store %arg14[%c0_12, %c0_13], %16 {strides = array<i32>} : memref<8x32xf32, #tpu.memory_space<vmem>>, vector<8x32xf32>,
      %c0_14 = arith.constant 0 : index
      %c0_15 = arith.constant 0 : index
      %c0_16 = arith.constant 0 : index
      %18 = vector.load %arg4[%c0_14, %c0_15, %c0_16] : memref<1x8x32xf32, #tpu.memory_space<vmem>>, vector<1x8x32xf32>
      %19 = vector.shape_cast %18 : vector<1x8x32xf32> to vector<8x32xf32>
      %c0_17 = arith.constant 0 : index
      %c0_18 = arith.constant 0 : index
      %20 = vector.load %arg6[%c0_17, %c0_18] : memref<32x32xf32, #tpu.memory_space<vmem>>, vector<32x32xf32>
      %cst_19 = arith.constant dense<0.000000e+00> : vector<8x32xf32>
      %21 = tpu.matmul %19, %20, %cst_19 {dimension_numbers = #tpu.dot_dimension_numbers<[1], [0], [0], [1], [0, 0, 1, 1], [], []>} : vector<8x32xf32>, vector<32x32xf32>, vector<8x32xf32> -> vector<8x32xf32>
      %c0_20 = arith.constant 0 : index
      %c0_21 = arith.constant 0 : index
      %22 = vector.load %arg11[%c0_20, %c0_21] : memref<8x32xf32, #tpu.memory_space<vmem>>, vector<8x32xf32>
      tpu.vector_store %arg11[%c0_20, %c0_21], %21 {strides = array<i32>} : memref<8x32xf32, #tpu.memory_space<vmem>>, vector<8x32xf32>,
    } else {
    }
    %c8_i32 = arith.constant 8 : i32
    %3 = arith.muli %arg2, %c8_i32 : i32
    %c1_i32 = arith.constant 1 : i32
    %4 = arith.addi %arg1, %c1_i32 : i32
    %c8_i32_1 = arith.constant 8 : i32
    %5 = arith.muli %4, %c8_i32_1 : i32
    %6 = arith.cmpi slt, %3, %5 : i32
    %7 = arith.extui %6 : i1 to i32
    %c0_i32_2 = arith.constant 0 : i32
    %8 = arith.cmpi ne, %7, %c0_i32_2 : i32
    scf.if %8 {
      %c0 = arith.constant 0 : index
      %c0_5 = arith.constant 0 : index
      %c0_6 = arith.constant 0 : index
      %12 = vector.load %arg3[%c0, %c0_5, %c0_6] : memref<1x8x32xf32, #tpu.memory_space<vmem>>, vector<1x8x32xf32>
      %13 = vector.shape_cast %12 : vector<1x8x32xf32> to vector<8x32xf32>
      %c0_7 = arith.constant 0 : index
      %c0_8 = arith.constant 0 : index
      %14 = vector.load %arg5[%c0_7, %c0_8] : memref<32x32xf32, #tpu.memory_space<vmem>>, vector<32x32xf32>
      %cst = arith.constant dense<0.000000e+00> : vector<8x32xf32>
      %15 = tpu.matmul %13, %14, %cst {dimension_numbers = #tpu.dot_dimension_numbers<[1], [0], [0], [1], [0, 0, 1, 1], [], []>} : vector<8x32xf32>, vector<32x32xf32>, vector<8x32xf32> -> vector<8x32xf32>
      %c0_9 = arith.constant 0 : index
      %c0_10 = arith.constant 0 : index
      %16 = vector.load %arg7[%c0_9, %c0_10] : memref<32x32xf32, #tpu.memory_space<vmem>>, vector<32x32xf32>
      %cst_11 = arith.constant dense<0.000000e+00> : vector<8x32xf32>
      %17 = tpu.matmul %13, %16, %cst_11 {dimension_numbers = #tpu.dot_dimension_numbers<[1], [0], [0], [1], [0, 0, 1, 1], [], []>} : vector<8x32xf32>, vector<32x32xf32>, vector<8x32xf32> -> vector<8x32xf32>
      %c8_i32_12 = arith.constant 8 : i32
      %18 = arith.muli %arg1, %c8_i32_12 : i32
      %19 = tpu.iota {dimensions = array<i32: 0>} : vector<8x8xi32>
      %20 = vector.broadcast %18 : i32 to vector<8x8xi32>
      %21 = arith.addi %20, %19 : vector<8x8xi32>
      %c8_i32_13 = arith.constant 8 : i32
      %22 = arith.muli %arg2, %c8_i32_13 : i32
      %23 = tpu.iota {dimensions = array<i32: 1>} : vector<8x8xi32>
      %24 = vector.broadcast %22 : i32 to vector<8x8xi32>
      %25 = arith.addi %24, %23 : vector<8x8xi32>
      %26 = arith.cmpi sle, %25, %21 : vector<8x8xi32>
      %c0_14 = arith.constant 0 : index
      %c0_15 = arith.constant 0 : index
      %27 = vector.load %arg11[%c0_14, %c0_15] : memref<8x32xf32, #tpu.memory_space<vmem>>, vector<8x8xf32>
      %28 = vector.extract_strided_slice %15 {offsets = [0, 0], sizes = [8, 8], strides = [1, 1]} : vector<8x32xf32> to vector<8x8xf32>
      %29 = vector.extract_strided_slice %17 {offsets = [0, 0], sizes = [8, 8], strides = [1, 1]} : vector<8x32xf32> to vector<8x8xf32>
      %cst_16 = arith.constant dense<0.000000e+00> : vector<8x8xf32>
      %30 = tpu.matmul %27, %28, %cst_16 {dimension_numbers = #tpu.dot_dimension_numbers<[1], [1], [0], [0], [0, 0, 1, 0], [], []>} : vector<8x8xf32>, vector<8x8xf32>, vector<8x8xf32> -> vector<8x8xf32>
      %cst_17 = arith.constant 0xFF800000 : f32
      %31 = vector.broadcast %cst_17 : f32 to vector<8x8xf32>
      %32 = arith.select %26, %30, %31 : vector<8x8xi1>, vector<8x8xf32>
      %c0_18 = arith.constant 0 : index
      %c0_19 = arith.constant 0 : index
      %c0_20 = arith.constant 0 : index
      %33 = vector.load %arg12[%c0_18, %c0_19, %c0_20] : memref<4x8x1xf32, #tpu.memory_space<vmem>>, vector<1x8x1xf32>
      %34 = vector.shape_cast %33 : vector<1x8x1xf32> to vector<8x1xf32>
      %cst_21 = arith.constant dense<0xFF800000> : vector<8xf32>
      %35 = vector.multi_reduction <maximumf>, %32, %cst_21 [1] : vector<8x8xf32> to vector<8xf32>
      %36 = vector.shape_cast %35 : vector<8xf32> to vector<8x1xf32>
      %37 = arith.maximumf %34, %36 : vector<8x1xf32>
      %38 = arith.subf %34, %37 : vector<8x1xf32>
      %39 = math.exp %38 : vector<8x1xf32>
      %40 = vector.broadcast %37 : vector<8x1xf32> to vector<8x8xf32>
      %41 = arith.subf %32, %40 : vector<8x8xf32>
      %42 = math.exp %41 : vector<8x8xf32>
      %c0_22 = arith.constant 0 : index
      %c0_23 = arith.constant 0 : index
      %c0_24 = arith.constant 0 : index
      %43 = vector.load %arg13[%c0_22, %c0_23, %c0_24] : memref<4x8x1xf32, #tpu.memory_space<vmem>>, vector<1x8x1xf32>
      %44 = vector.shape_cast %43 : vector<1x8x1xf32> to vector<8x1xf32>
      %45 = arith.mulf %39, %44 : vector<8x1xf32>
      %cst_25 = arith.constant dense<0.000000e+00> : vector<8xf32>
      %46 = vector.multi_reduction <add>, %42, %cst_25 [1] : vector<8x8xf32> to vector<8xf32>
      %47 = vector.shape_cast %46 : vector<8xf32> to vector<8x1xf32>
      %48 = arith.addf %45, %47 : vector<8x1xf32>
      %c0_26 = arith.constant 0 : index
      %c0_27 = arith.constant 0 : index
      %c0_28 = arith.constant 0 : index
      %49 = vector.load %arg13[%c0_26, %c0_27, %c0_28] : memref<4x8x1xf32, #tpu.memory_space<vmem>>, vector<1x8x1xf32>
      %50 = vector.shape_cast %49 : vector<1x8x1xf32> to vector<8x1xf32>
      %51 = vector.shape_cast %48 : vector<8x1xf32> to vector<1x8x1xf32>
      tpu.vector_store %arg13[%c0_26, %c0_27, %c0_28], %51 {strides = array<i32>} : memref<4x8x1xf32, #tpu.memory_space<vmem>>, vector<1x8x1xf32>,
      %c0_29 = arith.constant 0 : index
      %c0_30 = arith.constant 0 : index
      %52 = vector.load %arg14[%c0_29, %c0_30] : memref<8x32xf32, #tpu.memory_space<vmem>>, vector<8x8xf32>
      %53 = vector.broadcast %39 : vector<8x1xf32> to vector<8x8xf32>
      %54 = arith.mulf %53, %52 : vector<8x8xf32>
      %cst_31 = arith.constant dense<0.000000e+00> : vector<8x8xf32>
      %55 = tpu.matmul %42, %29, %cst_31 {dimension_numbers = #tpu.dot_dimension_numbers<[1], [0], [0], [1], [0, 0, 1, 1], [], []>} : vector<8x8xf32>, vector<8x8xf32>, vector<8x8xf32> -> vector<8x8xf32>
      %56 = arith.addf %54, %55 : vector<8x8xf32>
      %c0_32 = arith.constant 0 : index
      %c0_33 = arith.constant 0 : index
      %57 = vector.load %arg14[%c0_32, %c0_33] : memref<8x32xf32, #tpu.memory_space<vmem>>, vector<8x8xf32>
      tpu.vector_store %arg14[%c0_32, %c0_33], %56 {strides = array<i32>} : memref<8x32xf32, #tpu.memory_space<vmem>>, vector<8x8xf32>,
      %c0_34 = arith.constant 0 : index
      %c0_35 = arith.constant 0 : index
      %c0_36 = arith.constant 0 : index
      %58 = vector.load %arg12[%c0_34, %c0_35, %c0_36] : memref<4x8x1xf32, #tpu.memory_space<vmem>>, vector<1x8x1xf32>
      %59 = vector.shape_cast %58 : vector<1x8x1xf32> to vector<8x1xf32>
      %60 = vector.shape_cast %37 : vector<8x1xf32> to vector<1x8x1xf32>
      tpu.vector_store %arg12[%c0_34, %c0_35, %c0_36], %60 {strides = array<i32>} : memref<4x8x1xf32, #tpu.memory_space<vmem>>, vector<1x8x1xf32>,
      %c0_37 = arith.constant 0 : index
      %c8 = arith.constant 8 : index
      %61 = vector.load %arg11[%c0_37, %c8] : memref<8x32xf32, #tpu.memory_space<vmem>>, vector<8x8xf32>
      %62 = vector.extract_strided_slice %15 {offsets = [0, 8], sizes = [8, 8], strides = [1, 1]} : vector<8x32xf32> to vector<8x8xf32>
      %63 = vector.extract_strided_slice %17 {offsets = [0, 8], sizes = [8, 8], strides = [1, 1]} : vector<8x32xf32> to vector<8x8xf32>
      %cst_38 = arith.constant dense<0.000000e+00> : vector<8x8xf32>
      %64 = tpu.matmul %61, %62, %cst_38 {dimension_numbers = #tpu.dot_dimension_numbers<[1], [1], [0], [0], [0, 0, 1, 0], [], []>} : vector<8x8xf32>, vector<8x8xf32>, vector<8x8xf32> -> vector<8x8xf32>
      %cst_39 = arith.constant 0xFF800000 : f32
      %65 = vector.broadcast %cst_39 : f32 to vector<8x8xf32>
      %66 = arith.select %26, %64, %65 : vector<8x8xi1>, vector<8x8xf32>
      %c1 = arith.constant 1 : index
      %c0_40 = arith.constant 0 : index
      %c0_41 = arith.constant 0 : index
      %67 = vector.load %arg12[%c1, %c0_40, %c0_41] : memref<4x8x1xf32, #tpu.memory_space<vmem>>, vector<1x8x1xf32>
      %68 = vector.shape_cast %67 : vector<1x8x1xf32> to vector<8x1xf32>
      %cst_42 = arith.constant dense<0xFF800000> : vector<8xf32>
      %69 = vector.multi_reduction <maximumf>, %66, %cst_42 [1] : vector<8x8xf32> to vector<8xf32>
      %70 = vector.shape_cast %69 : vector<8xf32> to vector<8x1xf32>
      %71 = arith.maximumf %68, %70 : vector<8x1xf32>
      %72 = arith.subf %68, %71 : vector<8x1xf32>
      %73 = math.exp %72 : vector<8x1xf32>
      %74 = vector.broadcast %71 : vector<8x1xf32> to vector<8x8xf32>
      %75 = arith.subf %66, %74 : vector<8x8xf32>
      %76 = math.exp %75 : vector<8x8xf32>
      %c1_43 = arith.constant 1 : index
      %c0_44 = arith.constant 0 : index
      %c0_45 = arith.constant 0 : index
      %77 = vector.load %arg13[%c1_43, %c0_44, %c0_45] : memref<4x8x1xf32, #tpu.memory_space<vmem>>, vector<1x8x1xf32>
      %78 = vector.shape_cast %77 : vector<1x8x1xf32> to vector<8x1xf32>
      %79 = arith.mulf %73, %78 : vector<8x1xf32>
      %cst_46 = arith.constant dense<0.000000e+00> : vector<8xf32>
      %80 = vector.multi_reduction <add>, %76, %cst_46 [1] : vector<8x8xf32> to vector<8xf32>
      %81 = vector.shape_cast %80 : vector<8xf32> to vector<8x1xf32>
      %82 = arith.addf %79, %81 : vector<8x1xf32>
      %c1_47 = arith.constant 1 : index
      %c0_48 = arith.constant 0 : index
      %c0_49 = arith.constant 0 : index
      %83 = vector.load %arg13[%c1_47, %c0_48, %c0_49] : memref<4x8x1xf32, #tpu.memory_space<vmem>>, vector<1x8x1xf32>
      %84 = vector.shape_cast %83 : vector<1x8x1xf32> to vector<8x1xf32>
      %85 = vector.shape_cast %82 : vector<8x1xf32> to vector<1x8x1xf32>
      tpu.vector_store %arg13[%c1_47, %c0_48, %c0_49], %85 {strides = array<i32>} : memref<4x8x1xf32, #tpu.memory_space<vmem>>, vector<1x8x1xf32>,
      %c0_50 = arith.constant 0 : index
      %c8_51 = arith.constant 8 : index
      %86 = vector.load %arg14[%c0_50, %c8_51] : memref<8x32xf32, #tpu.memory_space<vmem>>, vector<8x8xf32>
      %87 = vector.broadcast %73 : vector<8x1xf32> to vector<8x8xf32>
      %88 = arith.mulf %87, %86 : vector<8x8xf32>
      %cst_52 = arith.constant dense<0.000000e+00> : vector<8x8xf32>
      %89 = tpu.matmul %76, %63, %cst_52 {dimension_numbers = #tpu.dot_dimension_numbers<[1], [0], [0], [1], [0, 0, 1, 1], [], []>} : vector<8x8xf32>, vector<8x8xf32>, vector<8x8xf32> -> vector<8x8xf32>
      %90 = arith.addf %88, %89 : vector<8x8xf32>
      %c0_53 = arith.constant 0 : index
      %c8_54 = arith.constant 8 : index
      %91 = vector.load %arg14[%c0_53, %c8_54] : memref<8x32xf32, #tpu.memory_space<vmem>>, vector<8x8xf32>
      tpu.vector_store %arg14[%c0_53, %c8_54], %90 {strides = array<i32>} : memref<8x32xf32, #tpu.memory_space<vmem>>, vector<8x8xf32>,
      %c1_55 = arith.constant 1 : index
      %c0_56 = arith.constant 0 : index
      %c0_57 = arith.constant 0 : index
      %92 = vector.load %arg12[%c1_55, %c0_56, %c0_57] : memref<4x8x1xf32, #tpu.memory_space<vmem>>, vector<1x8x1xf32>
      %93 = vector.shape_cast %92 : vector<1x8x1xf32> to vector<8x1xf32>
      %94 = vector.shape_cast %71 : vector<8x1xf32> to vector<1x8x1xf32>
      tpu.vector_store %arg12[%c1_55, %c0_56, %c0_57], %94 {strides = array<i32>} : memref<4x8x1xf32, #tpu.memory_space<vmem>>, vector<1x8x1xf32>,
      %c0_58 = arith.constant 0 : index
      %c16 = arith.constant 16 : index
      %95 = vector.load %arg11[%c0_58, %c16] : memref<8x32xf32, #tpu.memory_space<vmem>>, vector<8x8xf32>
      %96 = vector.extract_strided_slice %15 {offsets = [0, 16], sizes = [8, 8], strides = [1, 1]} : vector<8x32xf32> to vector<8x8xf32>
      %97 = vector.extract_strided_slice %17 {offsets = [0, 16], sizes = [8, 8], strides = [1, 1]} : vector<8x32xf32> to vector<8x8xf32>
      %cst_59 = arith.constant dense<0.000000e+00> : vector<8x8xf32>
      %98 = tpu.matmul %95, %96, %cst_59 {dimension_numbers = #tpu.dot_dimension_numbers<[1], [1], [0], [0], [0, 0, 1, 0], [], []>} : vector<8x8xf32>, vector<8x8xf32>, vector<8x8xf32> -> vector<8x8xf32>
      %cst_60 = arith.constant 0xFF800000 : f32
      %99 = vector.broadcast %cst_60 : f32 to vector<8x8xf32>
      %100 = arith.select %26, %98, %99 : vector<8x8xi1>, vector<8x8xf32>
      %c2 = arith.constant 2 : index
      %c0_61 = arith.constant 0 : index
      %c0_62 = arith.constant 0 : index
      %101 = vector.load %arg12[%c2, %c0_61, %c0_62] : memref<4x8x1xf32, #tpu.memory_space<vmem>>, vector<1x8x1xf32>
      %102 = vector.shape_cast %101 : vector<1x8x1xf32> to vector<8x1xf32>
      %cst_63 = arith.constant dense<0xFF800000> : vector<8xf32>
      %103 = vector.multi_reduction <maximumf>, %100, %cst_63 [1] : vector<8x8xf32> to vector<8xf32>
      %104 = vector.shape_cast %103 : vector<8xf32> to vector<8x1xf32>
      %105 = arith.maximumf %102, %104 : vector<8x1xf32>
      %106 = arith.subf %102, %105 : vector<8x1xf32>
      %107 = math.exp %106 : vector<8x1xf32>
      %108 = vector.broadcast %105 : vector<8x1xf32> to vector<8x8xf32>
      %109 = arith.subf %100, %108 : vector<8x8xf32>
      %110 = math.exp %109 : vector<8x8xf32>
      %c2_64 = arith.constant 2 : index
      %c0_65 = arith.constant 0 : index
      %c0_66 = arith.constant 0 : index
      %111 = vector.load %arg13[%c2_64, %c0_65, %c0_66] : memref<4x8x1xf32, #tpu.memory_space<vmem>>, vector<1x8x1xf32>
      %112 = vector.shape_cast %111 : vector<1x8x1xf32> to vector<8x1xf32>
      %113 = arith.mulf %107, %112 : vector<8x1xf32>
      %cst_67 = arith.constant dense<0.000000e+00> : vector<8xf32>
      %114 = vector.multi_reduction <add>, %110, %cst_67 [1] : vector<8x8xf32> to vector<8xf32>
      %115 = vector.shape_cast %114 : vector<8xf32> to vector<8x1xf32>
      %116 = arith.addf %113, %115 : vector<8x1xf32>
      %c2_68 = arith.constant 2 : index
      %c0_69 = arith.constant 0 : index
      %c0_70 = arith.constant 0 : index
      %117 = vector.load %arg13[%c2_68, %c0_69, %c0_70] : memref<4x8x1xf32, #tpu.memory_space<vmem>>, vector<1x8x1xf32>
      %118 = vector.shape_cast %117 : vector<1x8x1xf32> to vector<8x1xf32>
      %119 = vector.shape_cast %116 : vector<8x1xf32> to vector<1x8x1xf32>
      tpu.vector_store %arg13[%c2_68, %c0_69, %c0_70], %119 {strides = array<i32>} : memref<4x8x1xf32, #tpu.memory_space<vmem>>, vector<1x8x1xf32>,
      %c0_71 = arith.constant 0 : index
      %c16_72 = arith.constant 16 : index
      %120 = vector.load %arg14[%c0_71, %c16_72] : memref<8x32xf32, #tpu.memory_space<vmem>>, vector<8x8xf32>
      %121 = vector.broadcast %107 : vector<8x1xf32> to vector<8x8xf32>
      %122 = arith.mulf %121, %120 : vector<8x8xf32>
      %cst_73 = arith.constant dense<0.000000e+00> : vector<8x8xf32>
      %123 = tpu.matmul %110, %97, %cst_73 {dimension_numbers = #tpu.dot_dimension_numbers<[1], [0], [0], [1], [0, 0, 1, 1], [], []>} : vector<8x8xf32>, vector<8x8xf32>, vector<8x8xf32> -> vector<8x8xf32>
      %124 = arith.addf %122, %123 : vector<8x8xf32>
      %c0_74 = arith.constant 0 : index
      %c16_75 = arith.constant 16 : index
      %125 = vector.load %arg14[%c0_74, %c16_75] : memref<8x32xf32, #tpu.memory_space<vmem>>, vector<8x8xf32>
      tpu.vector_store %arg14[%c0_74, %c16_75], %124 {strides = array<i32>} : memref<8x32xf32, #tpu.memory_space<vmem>>, vector<8x8xf32>,
      %c2_76 = arith.constant 2 : index
      %c0_77 = arith.constant 0 : index
      %c0_78 = arith.constant 0 : index
      %126 = vector.load %arg12[%c2_76, %c0_77, %c0_78] : memref<4x8x1xf32, #tpu.memory_space<vmem>>, vector<1x8x1xf32>
      %127 = vector.shape_cast %126 : vector<1x8x1xf32> to vector<8x1xf32>
      %128 = vector.shape_cast %105 : vector<8x1xf32> to vector<1x8x1xf32>
      tpu.vector_store %arg12[%c2_76, %c0_77, %c0_78], %128 {strides = array<i32>} : memref<4x8x1xf32, #tpu.memory_space<vmem>>, vector<1x8x1xf32>,
      %c0_79 = arith.constant 0 : index
      %c24 = arith.constant 24 : index
      %129 = vector.load %arg11[%c0_79, %c24] : memref<8x32xf32, #tpu.memory_space<vmem>>, vector<8x8xf32>
      %130 = vector.extract_strided_slice %15 {offsets = [0, 24], sizes = [8, 8], strides = [1, 1]} : vector<8x32xf32> to vector<8x8xf32>
      %131 = vector.extract_strided_slice %17 {offsets = [0, 24], sizes = [8, 8], strides = [1, 1]} : vector<8x32xf32> to vector<8x8xf32>
      %cst_80 = arith.constant dense<0.000000e+00> : vector<8x8xf32>
      %132 = tpu.matmul %129, %130, %cst_80 {dimension_numbers = #tpu.dot_dimension_numbers<[1], [1], [0], [0], [0, 0, 1, 0], [], []>} : vector<8x8xf32>, vector<8x8xf32>, vector<8x8xf32> -> vector<8x8xf32>
      %cst_81 = arith.constant 0xFF800000 : f32
      %133 = vector.broadcast %cst_81 : f32 to vector<8x8xf32>
      %134 = arith.select %26, %132, %133 : vector<8x8xi1>, vector<8x8xf32>
      %c3 = arith.constant 3 : index
      %c0_82 = arith.constant 0 : index
      %c0_83 = arith.constant 0 : index
      %135 = vector.load %arg12[%c3, %c0_82, %c0_83] : memref<4x8x1xf32, #tpu.memory_space<vmem>>, vector<1x8x1xf32>
      %136 = vector.shape_cast %135 : vector<1x8x1xf32> to vector<8x1xf32>
      %cst_84 = arith.constant dense<0xFF800000> : vector<8xf32>
      %137 = vector.multi_reduction <maximumf>, %134, %cst_84 [1] : vector<8x8xf32> to vector<8xf32>
      %138 = vector.shape_cast %137 : vector<8xf32> to vector<8x1xf32>
      %139 = arith.maximumf %136, %138 : vector<8x1xf32>
      %140 = arith.subf %136, %139 : vector<8x1xf32>
      %141 = math.exp %140 : vector<8x1xf32>
      %142 = vector.broadcast %139 : vector<8x1xf32> to vector<8x8xf32>
      %143 = arith.subf %134, %142 : vector<8x8xf32>
      %144 = math.exp %143 : vector<8x8xf32>
      %c3_85 = arith.constant 3 : index
      %c0_86 = arith.constant 0 : index
      %c0_87 = arith.constant 0 : index
      %145 = vector.load %arg13[%c3_85, %c0_86, %c0_87] : memref<4x8x1xf32, #tpu.memory_space<vmem>>, vector<1x8x1xf32>
      %146 = vector.shape_cast %145 : vector<1x8x1xf32> to vector<8x1xf32>
      %147 = arith.mulf %141, %146 : vector<8x1xf32>
      %cst_88 = arith.constant dense<0.000000e+00> : vector<8xf32>
      %148 = vector.multi_reduction <add>, %144, %cst_88 [1] : vector<8x8xf32> to vector<8xf32>
      %149 = vector.shape_cast %148 : vector<8xf32> to vector<8x1xf32>
      %150 = arith.addf %147, %149 : vector<8x1xf32>
      %c3_89 = arith.constant 3 : index
      %c0_90 = arith.constant 0 : index
      %c0_91 = arith.constant 0 : index
      %151 = vector.load %arg13[%c3_89, %c0_90, %c0_91] : memref<4x8x1xf32, #tpu.memory_space<vmem>>, vector<1x8x1xf32>
      %152 = vector.shape_cast %151 : vector<1x8x1xf32> to vector<8x1xf32>
      %153 = vector.shape_cast %150 : vector<8x1xf32> to vector<1x8x1xf32>
      tpu.vector_store %arg13[%c3_89, %c0_90, %c0_91], %153 {strides = array<i32>} : memref<4x8x1xf32, #tpu.memory_space<vmem>>, vector<1x8x1xf32>,
      %c0_92 = arith.constant 0 : index
      %c24_93 = arith.constant 24 : index
      %154 = vector.load %arg14[%c0_92, %c24_93] : memref<8x32xf32, #tpu.memory_space<vmem>>, vector<8x8xf32>
      %155 = vector.broadcast %141 : vector<8x1xf32> to vector<8x8xf32>
      %156 = arith.mulf %155, %154 : vector<8x8xf32>
      %cst_94 = arith.constant dense<0.000000e+00> : vector<8x8xf32>
      %157 = tpu.matmul %144, %131, %cst_94 {dimension_numbers = #tpu.dot_dimension_numbers<[1], [0], [0], [1], [0, 0, 1, 1], [], []>} : vector<8x8xf32>, vector<8x8xf32>, vector<8x8xf32> -> vector<8x8xf32>
      %158 = arith.addf %156, %157 : vector<8x8xf32>
      %c0_95 = arith.constant 0 : index
      %c24_96 = arith.constant 24 : index
      %159 = vector.load %arg14[%c0_95, %c24_96] : memref<8x32xf32, #tpu.memory_space<vmem>>, vector<8x8xf32>
      tpu.vector_store %arg14[%c0_95, %c24_96], %158 {strides = array<i32>} : memref<8x32xf32, #tpu.memory_space<vmem>>, vector<8x8xf32>,
      %c3_97 = arith.constant 3 : index
      %c0_98 = arith.constant 0 : index
      %c0_99 = arith.constant 0 : index
      %160 = vector.load %arg12[%c3_97, %c0_98, %c0_99] : memref<4x8x1xf32, #tpu.memory_space<vmem>>, vector<1x8x1xf32>
      %161 = vector.shape_cast %160 : vector<1x8x1xf32> to vector<8x1xf32>
      %162 = vector.shape_cast %139 : vector<8x1xf32> to vector<1x8x1xf32>
      tpu.vector_store %arg12[%c3_97, %c0_98, %c0_99], %162 {strides = array<i32>} : memref<4x8x1xf32, #tpu.memory_space<vmem>>, vector<1x8x1xf32>,
    } else {
    }
    %c0_i32_3 = arith.constant 0 : i32
    %9 = arith.cmpi eq, %arg2, %c0_i32_3 : i32
    %10 = arith.extui %9 : i1 to i32
    %c0_i32_4 = arith.constant 0 : i32
    %11 = arith.cmpi ne, %10, %c0_i32_4 : i32
    scf.if %11 {
      %c0 = arith.constant 0 : index
      %c0_5 = arith.constant 0 : index
      %c0_6 = arith.constant 0 : index
      %12 = vector.load %arg13[%c0, %c0_5, %c0_6] : memref<4x8x1xf32, #tpu.memory_space<vmem>>, vector<1x8x1xf32>
      %13 = vector.shape_cast %12 : vector<1x8x1xf32> to vector<8x1xf32>
      %14 = tpu.reciprocal %13 {approx = true} : vector<8x1xf32> -> vector<8x1xf32>
      %c0_7 = arith.constant 0 : index
      %c0_8 = arith.constant 0 : index
      %15 = vector.load %arg14[%c0_7, %c0_8] : memref<8x32xf32, #tpu.memory_space<vmem>>, vector<8x8xf32>
      %16 = vector.broadcast %14 : vector<8x1xf32> to vector<8x8xf32>
      %17 = arith.mulf %15, %16 : vector<8x8xf32>
      %c0_9 = arith.constant 0 : index
      %c0_10 = arith.constant 0 : index
      %18 = vector.load %arg14[%c0_9, %c0_10] : memref<8x32xf32, #tpu.memory_space<vmem>>, vector<8x8xf32>
      tpu.vector_store %arg14[%c0_9, %c0_10], %17 {strides = array<i32>} : memref<8x32xf32, #tpu.memory_space<vmem>>, vector<8x8xf32>,
      %c1 = arith.constant 1 : index
      %c0_11 = arith.constant 0 : index
      %c0_12 = arith.constant 0 : index
      %19 = vector.load %arg13[%c1, %c0_11, %c0_12] : memref<4x8x1xf32, #tpu.memory_space<vmem>>, vector<1x8x1xf32>
      %20 = vector.shape_cast %19 : vector<1x8x1xf32> to vector<8x1xf32>
      %21 = tpu.reciprocal %20 {approx = true} : vector<8x1xf32> -> vector<8x1xf32>
      %c0_13 = arith.constant 0 : index
      %c8 = arith.constant 8 : index
      %22 = vector.load %arg14[%c0_13, %c8] : memref<8x32xf32, #tpu.memory_space<vmem>>, vector<8x8xf32>
      %23 = vector.broadcast %21 : vector<8x1xf32> to vector<8x8xf32>
      %24 = arith.mulf %22, %23 : vector<8x8xf32>
      %c0_14 = arith.constant 0 : index
      %c8_15 = arith.constant 8 : index
      %25 = vector.load %arg14[%c0_14, %c8_15] : memref<8x32xf32, #tpu.memory_space<vmem>>, vector<8x8xf32>
      tpu.vector_store %arg14[%c0_14, %c8_15], %24 {strides = array<i32>} : memref<8x32xf32, #tpu.memory_space<vmem>>, vector<8x8xf32>,
      %c2 = arith.constant 2 : index
      %c0_16 = arith.constant 0 : index
      %c0_17 = arith.constant 0 : index
      %26 = vector.load %arg13[%c2, %c0_16, %c0_17] : memref<4x8x1xf32, #tpu.memory_space<vmem>>, vector<1x8x1xf32>
      %27 = vector.shape_cast %26 : vector<1x8x1xf32> to vector<8x1xf32>
      %28 = tpu.reciprocal %27 {approx = true} : vector<8x1xf32> -> vector<8x1xf32>
      %c0_18 = arith.constant 0 : index
      %c16 = arith.constant 16 : index
      %29 = vector.load %arg14[%c0_18, %c16] : memref<8x32xf32, #tpu.memory_space<vmem>>, vector<8x8xf32>
      %30 = vector.broadcast %28 : vector<8x1xf32> to vector<8x8xf32>
      %31 = arith.mulf %29, %30 : vector<8x8xf32>
      %c0_19 = arith.constant 0 : index
      %c16_20 = arith.constant 16 : index
      %32 = vector.load %arg14[%c0_19, %c16_20] : memref<8x32xf32, #tpu.memory_space<vmem>>, vector<8x8xf32>
      tpu.vector_store %arg14[%c0_19, %c16_20], %31 {strides = array<i32>} : memref<8x32xf32, #tpu.memory_space<vmem>>, vector<8x8xf32>,
      %c3 = arith.constant 3 : index
      %c0_21 = arith.constant 0 : index
      %c0_22 = arith.constant 0 : index
      %33 = vector.load %arg13[%c3, %c0_21, %c0_22] : memref<4x8x1xf32, #tpu.memory_space<vmem>>, vector<1x8x1xf32>
      %34 = vector.shape_cast %33 : vector<1x8x1xf32> to vector<8x1xf32>
      %35 = tpu.reciprocal %34 {approx = true} : vector<8x1xf32> -> vector<8x1xf32>
      %c0_23 = arith.constant 0 : index
      %c24 = arith.constant 24 : index
      %36 = vector.load %arg14[%c0_23, %c24] : memref<8x32xf32, #tpu.memory_space<vmem>>, vector<8x8xf32>
      %37 = vector.broadcast %35 : vector<8x1xf32> to vector<8x8xf32>
      %38 = arith.mulf %36, %37 : vector<8x8xf32>
      %c0_24 = arith.constant 0 : index
      %c24_25 = arith.constant 24 : index
      %39 = vector.load %arg14[%c0_24, %c24_25] : memref<8x32xf32, #tpu.memory_space<vmem>>, vector<8x8xf32>
      tpu.vector_store %arg14[%c0_24, %c24_25], %38 {strides = array<i32>} : memref<8x32xf32, #tpu.memory_space<vmem>>, vector<8x8xf32>,
      %c0_26 = arith.constant 0 : index
      %c0_27 = arith.constant 0 : index
      %40 = vector.load %arg14[%c0_26, %c0_27] : memref<8x32xf32, #tpu.memory_space<vmem>>, vector<8x32xf32>
      %c0_28 = arith.constant 0 : index
      %c0_29 = arith.constant 0 : index
      %41 = vector.load %arg8[%c0_28, %c0_29] : memref<32x32xf32, #tpu.memory_space<vmem>>, vector<32x32xf32>
      %cst = arith.constant dense<0.000000e+00> : vector<8x32xf32>
      %42 = tpu.matmul %40, %41, %cst {dimension_numbers = #tpu.dot_dimension_numbers<[1], [0], [0], [1], [0, 0, 1, 1], [], []>} : vector<8x32xf32>, vector<32x32xf32>, vector<8x32xf32> -> vector<8x32xf32>
      %c0_30 = arith.constant 0 : index
      %c0_31 = arith.constant 0 : index
      %43 = vector.load %arg9[%c0_30, %c0_31] : memref<1x32xf32, #tpu.memory_space<vmem>>, vector<1x32xf32>
      %44 = vector.broadcast %43 : vector<1x32xf32> to vector<8x32xf32>
      %45 = arith.addf %42, %44 : vector<8x32xf32>
      %c0_32 = arith.constant 0 : index
      %c0_33 = arith.constant 0 : index
      %c0_34 = arith.constant 0 : index
      %46 = vector.load %arg10[%c0_32, %c0_33, %c0_34] : memref<1x8x32xf32, #tpu.memory_space<vmem>>, vector<1x8x32xf32>
      %47 = vector.shape_cast %46 : vector<1x8x32xf32> to vector<8x32xf32>
      %48 = vector.shape_cast %45 : vector<8x32xf32> to vector<1x8x32xf32>
      tpu.vector_store %arg10[%c0_32, %c0_33, %c0_34], %48 {strides = array<i32>} : memref<1x8x32xf32, #tpu.memory_space<vmem>>, vector<1x8x32xf32>,
    } else {
    }
    return
  }
  func.func @transform_0(%arg0: i32, %arg1: i32, %arg2: i32) -> (i32, i32, i32) {
    %c0_i32 = arith.constant 0 : i32
    %c0_i32_0 = arith.constant 0 : i32
    return %arg0, %arg2, %c0_i32 : i32, i32, i32
  }
  func.func @transform_1(%arg0: i32, %arg1: i32, %arg2: i32) -> (i32, i32, i32) {
    %c0_i32 = arith.constant 0 : i32
    %c0_i32_0 = arith.constant 0 : i32
    return %arg0, %arg1, %c0_i32 : i32, i32, i32
  }
  func.func @transform_2(%arg0: i32, %arg1: i32, %arg2: i32) -> (i32, i32) {
    %c0_i32 = arith.constant 0 : i32
    %c0_i32_0 = arith.constant 0 : i32
    %c0_i32_1 = arith.constant 0 : i32
    return %c0_i32, %c0_i32_0 : i32, i32
  }
  func.func @transform_3(%arg0: i32, %arg1: i32, %arg2: i32) -> (i32, i32) {
    %c0_i32 = arith.constant 0 : i32
    %c0_i32_0 = arith.constant 0 : i32
    %c0_i32_1 = arith.constant 0 : i32
    return %c0_i32, %c0_i32_0 : i32, i32
  }
  func.func @transform_4(%arg0: i32, %arg1: i32, %arg2: i32) -> (i32, i32) {
    %c0_i32 = arith.constant 0 : i32
    %c0_i32_0 = arith.constant 0 : i32
    %c0_i32_1 = arith.constant 0 : i32
    return %c0_i32, %c0_i32_0 : i32, i32
  }
  func.func @transform_5(%arg0: i32, %arg1: i32, %arg2: i32) -> (i32, i32) {
    %c0_i32 = arith.constant 0 : i32
    %c0_i32_0 = arith.constant 0 : i32
    %c0_i32_1 = arith.constant 0 : i32
    return %c0_i32, %c0_i32_0 : i32, i32
  }
  func.func @transform_6(%arg0: i32, %arg1: i32, %arg2: i32) -> (i32, i32) {
    %c0_i32 = arith.constant 0 : i32
    %c0_i32_0 = arith.constant 0 : i32
    %c0_i32_1 = arith.constant 0 : i32
    return %c0_i32, %c0_i32_0 : i32, i32
  }
  func.func @transform_7(%arg0: i32, %arg1: i32, %arg2: i32) -> (i32, i32, i32) {
    %c0_i32 = arith.constant 0 : i32
    %c0_i32_0 = arith.constant 0 : i32
    return %arg0, %arg1, %c0_i32 : i32, i32, i32
  }
}

</mosaic_0001>

<bundles_post_ra>
// kernel: a_call__.1
= control target key start
LH: loop header
LB: loop body
LE: loop exit
PB: predicated region body
PF: predicated region fallthrough
CT: control target
= control target key end

     0   :  { %s1972_s0 = inlined_call_operand.hbm [shape: f32[2,8,32], index: 0, kind: input, shape index: {}]   ;;  %s1973_s1 = inlined_call_operand.hbm [shape: f32[2,8,32], index: 1, kind: input, shape index: {}]   ;;  %s1974_s2 = inlined_call_operand.hbm [shape: f32[32,32], index: 2, kind: input, shape index: {}]   ;;  %s1975_s3 = inlined_call_operand.hbm [shape: f32[32,32], index: 3, kind: input, shape index: {}]   ;;  %s1976_s4 = inlined_call_operand.hbm [shape: f32[32,32], index: 4, kind: input, shape index: {}]   ;;  %s1977_s5 = inlined_call_operand.hbm [shape: f32[32,32], index: 5, kind: input, shape index: {}]   ;;  %s1978_s6 = inlined_call_operand.vmem [shape: f32[1,32], index: 6, kind: input, shape index: {}]   ;;  %s1979_s7 = inlined_call_operand.hbm [shape: f32[2,8,32], index: 7, kind: output, shape index: {}]  }
   0x1   :  { %1983 = sst [smem:[#allocation28_spill]] %s1974_s2 }
   0x2   :  { %1984 = sst [smem:[#allocation29_spill]] %s1975_s3 }
   0x3   :  { %1985 = sst [smem:[#allocation30_spill]] %s1976_s4 }
   0x4   :  { %1986 = sst [smem:[#allocation31_spill]] %s1977_s5 }
   0x5   :  { %12 = vsyncpa [#allocation7], 0 }
   0x6   :  { %14 = vsyncpa [#allocation7 + $0x1], 0 }
   0x7   :  { %15 = vsyncpa [#allocation10], 0 }
   0x8   :  { %17 = vsyncpa [#allocation10 + $0x1], 0 }
   0x9   :  { %18 = vsyncpa [#allocation13], 0 }
   0xa   :  { %19 = vsyncpa [#allocation16], 0 }
   0xb   :  { %20 = vsyncpa [#allocation8], 0 }
   0xc   :  { %22 = vsyncpa [#allocation8 + $0x1], 0  ;;  %s1688_s24 = smov 0   ;;  %s1690_s25 = smov 0  }
   0xd   :  { %s1692_s26 = smov 0   ;;  %s1694_s27 = smov 0  }
   0xe   :  { %s1696_s28 = smov 0   ;;  %s1698_s29 = smov 0  }
   0xf LB: > { %1987 = sst [smem:[#allocation24_spill]] %s1619_s26  ;;  %s1719_s30 = sadd.s32 4294967295, %s1631_s29   ;;  %s1631_s29 = sphi %s1698_s29, %s28_s29   ;;  %s1627_s28 = sphi %s1696_s28, %s2004_s28   ;;  %s1623_s27 = sphi %s1694_s27, %s2003_s27   ;;  %s1619_s26 = sphi %s1692_s26, %s2002_s26   ;;  %s1615_s25 = sphi %s1690_s25, %s2006_s25   ;;  %s1611_s24 = sphi %s1688_s24, %s2005_s24  }
  0x10   : > { %1988 = sst [smem:[#allocation25_spill]] %s1627_s28  ;;  %p1168_p0 = scmp.ge.s32.totalorder %s1631_s29, 1 }
  0x11   : > { %p70_p1 = scmp.eq.s32.totalorder %s1719_s30, 0  ;;  %p241_p2 = scmp.lt.s32.totalorder %s1631_s29, 3 }
  0x12   : > { %s1989_s2 = sld [smem:[#allocation28_spill]]  ;;  %s1633_s12 = smov [#allocation11]  }
  0x13   : > { %p1727_p3 = pnand %p1168_p0, %p241_p2  ;;  %s254_s13 = sshll.u32 %s1633_s12, 4  ;;  %s255_s13 = int_to_ptr.vmem [resolvable:$true] %s254_s13 }
  0x14   : > { %p1173_p6 = scmp.ge.s32.totalorder %s1631_s29, 2  ;;  %s1992_s3 = sld [smem:[#allocation29_spill]] }
  0x15   : > { %p1228_p4 = pneg %p1727_p3  ;;  %s1634_s18 = smov 128  }
  0x16   : > { %s1635_s19 = smov 8   ;;  %s1636_s20 = smov [#allocation12]  }
  0x17   : > { %p1735_p5 = pnand %p1228_p4, %p70_p1  ;;  %s268_s21 = sshll.u32 %s1636_s20, 4  ;;  %s269_s21 = int_to_ptr.vmem [resolvable:$true] %s268_s21 }
  0x18   : > { %s252_s10 = sshll.u32 %s1989_s2, 4  ;;  %s1993_s4 = sld [smem:[#allocation30_spill]]  ;;  %s253_s10 = int_to_ptr.hbm [resolvable:$true] %s252_s10 }
  0x19   : > { %1231 = dma.hbm_to_vmem [thread:$0]  (!%p1735_p5), %s253_s10, 512, %s255_s13, [#allocation10], %s1634_s18, %s1634_s18, %s1635_s19  }
  0x1a   : > { %s266_s17 = sshll.u32 %s1992_s3, 4  ;;  %s1994_s5 = sld [smem:[#allocation31_spill]]  ;;  %s267_s17 = int_to_ptr.hbm [resolvable:$true] %s266_s17 }
  0x1b   : > { %1234 = dma.hbm_to_vmem [thread:$0]  (!%p1735_p5), %s267_s17, 512, %s269_s21, [#allocation13], %s1634_s18, %s1634_s18, %s1635_s19  }
  0x1c   : > { %s1637_s13 = smov [#allocation14]   ;;  %s1638_s16 = smov [#allocation15]  }
  0x1d   : > { %s282_s15 = sshll.u32 %s1637_s13, 4  ;;  %s296_s20 = sshll.u32 %s1638_s16, 4  ;;  %s283_s15 = int_to_ptr.vmem [resolvable:$true] %s282_s15  ;;  %s297_s20 = int_to_ptr.vmem [resolvable:$true] %s296_s20 }
  0x1e   : > { %s280_s8 = sshll.u32 %s1993_s4, 4  ;;  %s1167_s17 = sadd.s32 4294967294, %s1631_s29   ;;  %s281_s8 = int_to_ptr.hbm [resolvable:$true] %s280_s8 }
  0x1f   : > { %1237 = dma.hbm_to_vmem [thread:$0]  (!%p1735_p5), %s281_s8, 512, %s283_s15, [#allocation13], %s1634_s18, %s1634_s18, %s1635_s19  }
  0x20   : > { %s294_s10 = sshll.u32 %s1994_s5, 4  ;;  %s47_s21 = sadd.s32 1, %s1627_s28  ;;  %s295_s10 = int_to_ptr.hbm [resolvable:$true] %s294_s10 }
  0x21   : > { %1240 = dma.hbm_to_vmem [thread:$0]  (!%p1735_p5), %s295_s10, 512, %s297_s20, [#allocation16], %s1634_s18, %s1634_s18, %s1635_s19  }
  0x22   : > { %p49_p7 = scmp.ge.s32.totalorder %s47_s21, 2  ;;  %s56_s22 = sadd.s32 1, %s1619_s26 }
  0x23   : > { %p63_p8 = scmp.ne.s32.totalorder %s1619_s26, %s1615_s25  ;;  %p64_p9 = scmp.eq.s32.totalorder %s1631_s29, 0 }
  0x24   : > { %s2008_s21 = smov (%p49_p7, %s47_s21), 0  ;;  %p69_p11 = scmp.ne.s32.totalorder %s1615_s25, %s1611_s24 }
  0x25   : > { %1995 = sst [smem:[#allocation26_spill]] %s2008_s21  ;;  %p1765_p10 = por %p64_p9, %p63_p8 }
  0x26   : > { %s51_s14 = ssub.s32 %s1627_s28, %s2008_s21  ;;  %p228_p12 = scmp.eq.s32.totalorder %s1719_s30, 1 }
  0x27   : > { %p54_p13 = scmp.eq.s32.totalorder %s51_s14, 0  ;;  %p1776_p0 = por %p70_p1, %p69_p11 }
  0x28   : > { %p1780_p2 = por %p228_p12, %p63_p8  ;;  %p234_p4 = scmp.eq.s32.totalorder %s1167_s17, 1 }
  0x29   : > { %s1785_s8 = scalar_select %p54_p13, %s1619_s26, %s56_s22  }
  0x2a   : > { %p1787_p5 = por %p234_p4, %p69_p11  ;;  %p1256_p7 = scmp.lt.s32.totalorder %s1631_s29, 2 }
  0x2b   : > { %1999 = sst [smem:[#allocation27_spill]] %s1785_s8  ;;  %s313_s12 = sand.u32 1, %s1619_s26  }
  0x2c   : > { %s1175_s10 = sshll.u32 %s1627_s28, 3  ;;  %s1174_s13 = sshll.u32 %s313_s12, 3 }
  0x2d   : > { %s322_s20 = scalar_lea.hbm %s1972_s0, %s1175_s10  ;;  %s317_s2 = scalar_lea.vmem [#allocation6], %s1174_s13 }
  0x2e   : > { %s324_s14 = sshll.u32 %s322_s20, 4  ;;  %s326_s3 = sshll.u32 %s317_s2, 4  ;;  %s325_s14 = int_to_ptr.hbm [resolvable:$true] %s324_s14  ;;  %s327_s3 = int_to_ptr.vmem [resolvable:$true] %s326_s3 }
  0x2f   : > { %p1242_p8 = pnand %p1256_p7, %p1765_p10  ;;  %s342_s4 = scalar_lea.hbm %s1973_s1, %s1175_s10 }
  0x30   : > { %s333_s5 = sand.u32 1, %s1631_s29   ;;  %s314_s21 = scalar_lea.sflag [#allocation7], %s313_s12 }
  0x31   : > { %1244 = dma.hbm_to_vmem [thread:$0]  (!%p1242_p8), %s325_s14, 128, %s327_s3, %s314_s21  }
  0x32   : > { %s344_s28 = sshll.u32 %s342_s4, 4  ;;  %s337_s8 = scalar_lea.vmem [#allocation9], %s1174_s13  ;;  %s345_s28 = int_to_ptr.hbm [resolvable:$true] %s344_s28 }
  0x33   : > { %s346_s26 = sshll.u32 %s337_s8, 4  ;;  %s334_s15 = scalar_lea.sflag [#allocation10], %s333_s5  ;;  %s347_s26 = int_to_ptr.vmem [resolvable:$true] %s346_s26 }
  0x34   : > { %1247 = dma.hbm_to_vmem [thread:$0]  (!%p1242_p8), %s345_s28, 128, %s347_s26, %s334_s15  }
  0x35   : > { %355 = sbr.rel (%p1727_p3) target bundleno = 1133 (0x46d), region = 48  ;;  %s1806_s2 = sand.u32 (!%p1727_p3), 1, %s1615_s25  }
  0x36   : > { %s1809_s23 = sshll.u32 (!%p1727_p3), %s1806_s2, 3  ;;  %s358_s3 = scalar_lea.sflag (!%p1727_p3), [#allocation7], %s1806_s2 }
  0x37   : > { %s361_s4 = scalar_lea.vmem (!%p1727_p3), [#allocation6], %s1809_s23 }
  0x3a   : > { %1586 = dma.done.wait (%p1776_p0), %s358_s3, 128  }
  0x3b   : > { %1588 = vsyncadd (%p1776_p0), %s358_s3, 4294967168  ;;  %s367_s5 = sand.u32 1, %s1719_s30   ;;  %s371_s28 = scalar_lea.vmem [#allocation9], %s1809_s23 }
  0x3c   : > { %s368_s26 = scalar_lea.sflag [#allocation10], %s367_s5 }
  0x3d   : > { %1590 = dma.done.wait (%p1776_p0), %s368_s26, 128  }
  0x3e   : > { %1592 = vsyncadd (%p1776_p0), %s368_s26, 4294967168 }
  0x3f   : > { %1594 = dma.done.wait (%p70_p1), [#allocation10], 512  }
  0x40   : > { %1596 = vsyncadd (%p70_p1), [#allocation10], 4294966784 }
  0x41   : > { %1598 = dma.done.wait (%p70_p1), [#allocation13], 1024  }
  0x42   : > { %1600 = vsyncadd (%p70_p1), [#allocation13], 4294966272 }
  0x43   : > { %1602 = dma.done.wait (%p70_p1), [#allocation16], 512  }
  0x44   : > { %1604 = vsyncadd (%p70_p1), [#allocation16], 4294966784  ;;  %vm441_vm0 = vcmask 261120   ;;  %v1639_v0 = vmov 0.0   ;;  %v447_v1 = vld [vmem:[#allocation12 + $0x18] sm:$0xff]  ;;  %v446_v3 = vld [vmem:[#allocation12 + $0x10] sm:$0xff]  ;;  %v533_v22 = vlaneseq }
  0x45   : > { %442 = vst.msk [vmem:[#allocation5] sm:$0xff] %vm441_vm0, %v1639_v0  ;;  %v483_v2 = vld [vmem:[#allocation11 + $0x18] sm:$0xff]  ;;  %463 = vmatpush.msra.mxu0 %v447_v1  ;;  %v482_v4 = vld [vmem:[#allocation11 + $0x10] sm:$0xff]  ;;  %v445_v5 = vld [vmem:[#allocation12 + $0x8] sm:$0xff]  ;;  %vm543_vm1 = vcmask 64512   ;;  %s1640_s30 = smov 104  }
  0x46   : > { %500 = vmatpush.msra.mxu1 %v483_v2  ;;  %v481_v6 = vld [vmem:[#allocation11 + $0x8] sm:$0xff]  ;;  %v444_v7 = vld [vmem:[#allocation12] sm:$0xff]  ;;  %v443_v9 = vld [vmem:[%s371_s28] sm:$0xff]  ;;  %s1641_s11 = smov 120   ;;  %s1642_s21 = smov 112   ;;  %v534_v25 = vshrl.u32 %v533_v22, 7 }
  0x47   : > { %464 = vmatpush.msra.mxu0 %v446_v3  ;;  %v480_v8 = vld [vmem:[#allocation11] sm:$0xff]  ;;  %v511_v14 = vld [vmem:[#allocation14 + $0x18] sm:$0xff]  ;;  %v510_v15 = vld [vmem:[#allocation14 + $0x10] sm:$0xff]  ;;  %v538_v26 = vand.u32 127, %v533_v22  ;;  %vm432_vm3 = vcmask 7168   ;;  %v1643_v30 = vmov -inf  }
  0x48   : > { %501 = vmatpush.msra.mxu1 %v482_v4  ;;  %v479_v10 = vld [vmem:[%s361_s4] sm:$0xff]  ;;  %524 = vmatpush.msra.mxu2 %v511_v14  ;;  %433 = vst.msk [vmem:[#allocation3] sm:$0xff] %vm432_vm3, %v1643_v30  ;;  %v1644_v32 = vmov 0   ;;  %s1645_s18 = smov 16   ;;  %s1646_s8 = smov 8   ;;  %vm723_vm4 = vcmask 130112  }
  0x49   : > { %465 = vmatpush.msra.mxu0 %v445_v5  ;;  %v509_v16 = vld [vmem:[#allocation14 + $0x8] sm:$0xff]  ;;  %v508_v17 = vld [vmem:[#allocation14] sm:$0xff]  ;;  %vm541_vm2 = vcmp.le.s32.totalorder %v538_v26, %v534_v25  ;;  %434 = vst.msk [vmem:[#allocation3 + $0x8] sm:$0xff] %vm432_vm3, %v1643_v30  ;;  %1325 = vset.pattern.permute.xlu0 %v1644_v32  ;;  %s1647_s12 = smov 24   ;;  %vm820_vm5 = vcmask 195712   ;;  %vm917_vm6 = vcmask 261312  }
  0x4a   : > { %502 = vmatpush.msra.mxu1 %v481_v6  ;;  %525 = vmatpush.msra.mxu2 %v510_v15  ;;  %435 = vst.msk [vmem:[#allocation3 + $0x10] sm:$0xff] %vm432_vm3, %v1643_v30  ;;  %s1203_s10 = sshll.u32 %s1623_s27, 3  ;;  %s427_s22 = scalar_lea.vmem [#allocation17], %s1809_s23 }
  0x4b   : > { %466 = vmatpush.msra.mxu0 %v444_v7  ;;  %436 = vst.msk [vmem:[#allocation3 + $0x18] sm:$0xff] %vm432_vm3, %v1643_v30  ;;  %1326 = vset.pattern.permute.xlu1 %v1644_v32  ;;  %s1016_s20 = scalar_lea.hbm %s1979_s7, %s1203_s10  ;;  %s1018_s15 = sshll.u32 %s427_s22, 4  ;;  %s1019_s15 = int_to_ptr.vmem [resolvable:$true] %s1018_s15 }
  0x4c   : > { %503 = vmatpush.msra.mxu1 %v480_v8  ;;  %1186 = vmatmul.msk.f32.vlgmr.msra.gmra.mxu0 %vm441_vm0, %v443_v9  ;;  %437 = vst.msk [vmem:[#allocation4] sm:$0xff] %vm432_vm3, %v1639_v0  ;;  %s1020_s3 = sshll.u32 %s1016_s20, 4  ;;  %s1005_s4 = scalar_lea.sflag [#allocation8], %s1806_s2  ;;  %s1021_s3 = int_to_ptr.hbm [resolvable:$true] %s1020_s3 }
  0x4d   : > { %1187 = vmatmul.msk.f32.vlgmr.msra.gmra.mxu1 %vm441_vm0, %v479_v10  ;;  %526 = vmatpush.msra.mxu2 %v509_v16  ;;  %438 = vst.msk [vmem:[#allocation4 + $0x8] sm:$0xff] %vm432_vm3, %v1639_v0  ;;  %s1547_s27 = sshra.s32 %s1021_s3, 4  ;;  %s1553_s23 = scalar_lea.hbm %s1979_s7, 16  ;;  %s1548_s27 = int_to_ptr.hbm [resolvable:$true] %s1547_s27 }
  0x4e   : > { %439 = vst.msk [vmem:[#allocation4 + $0x10] sm:$0xff] %vm432_vm3, %v1639_v0  ;;  %1327 = vset.pattern.permute.xlu2 %v1644_v32  ;;  %s1549_s5 = scalar_lea.hbm %s1548_s27, 8  ;;  %p1554_p10 = scmp.lt.s32.totalorder %s1548_s27, %s1979_s7 }
  0x4f   : > { %527 = vmatpush.msra.mxu2 %v508_v17  ;;  %440 = vst.msk [vmem:[#allocation4 + $0x18] sm:$0xff] %vm432_vm3, %v1639_v0  ;;  %v571_v36 = vld [vmem:[#allocation3] sm:$0xff]  ;;  %p1550_p1 = scmp.ne.s32.totalorder %s1548_s27, %s1549_s5  ;;  %p1555_p11 = scmp.lt.s32.totalorder %s1553_s23, %s1549_s5 }
  0x50   : > { %1188 = vmatmul.msk.f32.vlgmr.msra.gmra.mxu2 %vm441_vm0, %v479_v10  ;;  %v660_v46 = vld [vmem:[#allocation3 + $0x8] sm:$0xff] }
  0x51   : > { %v758_v54 = vld [vmem:[#allocation3 + $0x10] sm:$0xff]  ;;  %p1551_p3 = pnand %p1550_p1, %p1780_p2  ;;  %p1556_p12 = por %p1555_p11, %p1554_p10 }
  0x52   : > { %v1891_v60 = vld [vmem:[#allocation3 + $0x18] sm:$0xff] }
  0x53   : > { %p1552_p9 = pneg %p1551_p3 }
  0x55   : > { %p1557_p13 = pnand %p1556_p12, %p1552_p9 }
  0xc9   : > { %v468_v11 = vpop.f32.mrf.mxu0 }
  0xca   : > { %v505_v12 = vpop.f32.mrf.mxu1  ;;  %471 = vst.msk [vmem:[#allocation2] sm:$0xff] %vm441_vm0, %v468_v11 }
  0xcb   : > { %827 = vrot.lane.b32.xlu2 %v505_v12, %s1640_s30  ;;  %632 = vrot.lane.b32.xlu0 %v505_v12, %s1641_s11 }
  0xcc   : > { %1189 = vmatpush.xpose.msk.msra.mxu3 %vm543_vm1, %v505_v12 }
  0xd1   : > { %v823_v13 = vld [vmem:[#allocation2] sm:$0xff] }
  0xd2   : > { %630 = vrot.lane.b32.xlu1 %v823_v13, %s1641_s11  ;;  %1190 = vmatmul.msk.f32.vlgmr.msra.gmra.mxu3 %vm543_vm1, %v823_v13 }
  0xd3   : > { %730 = vrot.lane.b32.xlu0 %v505_v12, %s1642_s21  ;;  %825 = vrot.lane.b32.xlu2 %v823_v13, %s1640_s30  ;;  %v529_v31 = vpop.f32.mrf.mxu2 }
  0xd4   : > { %620 = vmatpush.msrb.mxu3 %v529_v31 }
  0xda   : > { %728 = vrot.lane.b32.xlu1 %v823_v13, %s1642_s21 }
 0x125   : > { %v828_v19 = vpop.permute.xlu2 %827 }
 0x12d   : > { %v826_v23 = vpop.permute.xlu2 %825 }
 0x13d   : > { %v633_v18 = vpop.permute.xlu0 %632 }
 0x13e   : > { %1192 = vmatpush.xpose.msk.msrb.mxu0 %vm543_vm1, %v633_v18 }
 0x142   : > { %1198 = vmatpush.xpose.msk.msra.mxu0 %vm543_vm1, %v828_v19  ;;  %v595_v19 = vld [vmem:[#allocation5] sm:$0xff] }
 0x144   : > { %v631_v21 = vpop.permute.xlu1 %630 }
 0x145   : > { %v731_v20 = vpop.permute.xlu0 %730  ;;  %1193 = vmatmul.msk.f32.vlgmr.msrb.gmra.mxu0 %vm543_vm1, %v631_v21 }
 0x146   : > { %1195 = vmatpush.xpose.msk.msrb.mxu2 %vm543_vm1, %v731_v20 }
 0x14c   : > { %v729_v24 = vpop.permute.xlu1 %728 }
 0x14d   : > { %1196 = vmatmul.msk.f32.vlgmr.msrb.gmra.mxu2 %vm543_vm1, %v729_v24  ;;  %1199 = vmatmul.msk.f32.vlgmr.msra.gmra.mxu0 %vm543_vm1, %v826_v23 }
 0x155   : > { %v567_v27 = vpop.f32.mrf.mxu3 }
 0x156   : > { %v570_v28 = vsel %vm541_vm2, %v567_v27, -inf }
 0x157   : > { %v572_v29 = vsel %vm543_vm1, %v570_v28, -inf }
 0x158   : > { %573 = vmax.xlane.f32.xlu0 %v572_v29 }
 0x1c2   : > { %v655_v33 = vpop.f32.mrf.mxu0 }
 0x1c3   : > { %v1872_v34 = vsel %vm541_vm2, %v655_v33, -inf  ;;  %v775_v33 = vld [vmem:[#allocation4 + $0x10] sm:$0xff] }
 0x1c4   : > { %v661_v35 = vsel %vm543_vm1, %v1872_v34, -inf }
 0x1c5   : > { %662 = vmax.xlane.f32.xlu1 %v661_v35 }
 0x1ca   : > { %v850_v43 = vpop.f32.mrf.mxu0 }
 0x1cb   : > { %v574_v37 = vpop.xlane.xlu0 %573  ;;  %v1880_v44 = vsel %vm541_vm2, %v850_v43, -inf }
 0x1cc   : > { %v575_v38 = vmax.f32 %v571_v36, %v574_v37  ;;  %v856_v45 = vsel %vm543_vm1, %v1880_v44, -inf  ;;  %v677_v37 = vld [vmem:[#allocation4 + $0x8] sm:$0xff] }
 0x1ce   : > { %v576_v39 = vsub.f32 %v571_v36, %v575_v38  ;;  %627 = vst.msk [vmem:[#allocation3] sm:$0xff] %vm432_vm3, %v575_v38  ;;  %581 = vperm.xlu0 %1325, %v575_v38  }
 0x1d0   : > { %v753_v40 = vpop.f32.mrf.mxu2  ;;  %v577_v61 = vmul.f32 1.442695, %v576_v39 }
 0x1d1   : > { %v756_v41 = vsel %vm541_vm2, %v753_v40, -inf }
 0x1d2   : > { %v759_v42 = vsel %vm543_vm1, %v756_v41, -inf }
 0x1d3   : > { %760 = vmax.xlane.f32.xlu2 %v759_v42 }
 0x1db   : > { %857 = vmax.xlane.f32.xlu2 %v856_v45 }
 0x238   : > { %v663_v47 = vpop.xlane.xlu1 %662 }
 0x239   : > { %v664_v48 = vmax.f32 %v660_v46, %v663_v47 }
 0x23b   : > { %v665_v49 = vsub.f32 %v660_v46, %v664_v48  ;;  %725 = vst.msk [vmem:[#allocation3 + $0x8] sm:$0xff] %vm432_vm3, %v664_v48  ;;  %670 = vperm.xlu1 %1326, %v664_v48   ;;  %v872_v48 = vld [vmem:[#allocation4 + $0x18] sm:$0xff] }
 0x23d   : > { %v666_v50 = vmul.f32 1.442695, %v665_v49 }
 0x23f   : > { %1329 = vpow2.f32 %v666_v50 }
 0x240   : > { %v582_v51 = vpop.permute.xlu0 %581 }
 0x241   : > { %v584_v52 = vsub.f32 %v570_v28, %v582_v51  ;;  %v587_v28 = vld [vmem:[#allocation4] sm:$0xff] }
 0x243   : > { %v585_v53 = vmul.f32 1.442695, %v584_v52  ;;  %692 = vrot.lane.b32.xlu1 %v529_v31, %s1641_s11 }
 0x245   : > { %v1886_v55 = vpop.eup %1329  ;;  %1331 = vpow2.f32 %v585_v53 }
 0x246   : > { %v761_v56 = vpop.xlane.xlu2 %760  ;;  %687 = vperm.xlu0 %1325, %v1886_v55   ;;  %1333 = vpow2.f32 %v577_v61  ;;  %v678_v38 = vmul.f32 %v1886_v55, %v677_v37 }
 0x247   : > { %v762_v57 = vmax.f32 %v758_v54, %v761_v56 }
 0x249   : > { %v763_v58 = vsub.f32 %v758_v54, %v762_v57  ;;  %822 = vst.msk [vmem:[#allocation3 + $0x10] sm:$0xff] %vm432_vm3, %v762_v57  ;;  %768 = vperm.xlu2 %1327, %v762_v57  }
 0x24b   : > { %v1332_v59 = vpop.eup %1331  ;;  %v764_v27 = vmul.f32 1.442695, %v763_v58 }
 0x24c   : > { %1191 = vmatmul.msk.f32.vlgmr.msrb.gmra.mxu3 %vm543_vm1, %v1332_v59  ;;  %v1334_v1 = vpop.eup %1333  ;;  %v589_v2 = vsel %vm543_vm1, %v1332_v59, 0.0 }
 0x24d   : > { %v588_v29 = vmul.f32 %v1334_v1, %v587_v28 }
 0x24e   : > { %v858_v62 = vpop.xlane.xlu2 %857 }
 0x24f   : > { %v1894_v63 = vmax.f32 %v1891_v60, %v858_v62 }
 0x251   : > { %v860_v0 = vsub.f32 %v1891_v60, %v1894_v63  ;;  %919 = vst.msk [vmem:[#allocation3 + $0x18] sm:$0xff] %vm432_vm3, %v1894_v63  ;;  %789 = vrot.lane.b32.xlu2 %v529_v31, %s1642_s21  ;;  %865 = vperm.xlu1 %1326, %v1894_v63  }
 0x253   : > { %v861_v42 = vmul.f32 1.442695, %v860_v0 }
 0x259   : > { %886 = vrot.lane.b32.xlu2 %v529_v31, %s1640_s30  ;;  %598 = vperm.xlu1 %1326, %v1334_v1  }
 0x270   : > { %590 = vadd.xlane.f32.xlu0 %v589_v2 }
 0x2a3   : > { %v769_v3 = vpop.permute.xlu2 %768 }
 0x2a4   : > { %v771_v4 = vsub.f32 %v756_v41, %v769_v3 }
 0x2a6   : > { %v772_v5 = vmul.f32 1.442695, %v771_v4 }
 0x2a8   : > { %1335 = vpow2.f32 %v772_v5 }
 0x2ab   : > { %v790_v6 = vpop.permute.xlu2 %789 }
 0x2ac   : > { %810 = vmatpush.msra.mxu3 %v790_v6 }
 0x2ad   : > { %v671_v7 = vpop.permute.xlu1 %670 }
 0x2ae   : > { %v1336_v8 = vpop.eup %1335  ;;  %v673_v9 = vsub.f32 %v1872_v34, %v671_v7 }
 0x2af   : > { %1197 = vmatmul.msk.f32.vlgmr.msra.gmra.mxu3 %vm543_vm1, %v1336_v8  ;;  %v777_v10 = vsel %vm543_vm1, %v1336_v8, 0.0 }
 0x2b0   : > { %v674_v11 = vmul.f32 1.442695, %v673_v9  ;;  %778 = vadd.xlane.f32.xlu1 %v777_v10 }
 0x2b2   : > { %1337 = vpow2.f32 %v674_v11  ;;  %v974_v11 = vld [vmem:[#allocation15 + $0x18] sm:$0xff] }
 0x2b3   : > { %v887_v13 = vpop.permute.xlu2 %886  ;;  %995 = vmatpush.msra.mxu2 %v974_v11 }
 0x2b5   : > { %v693_v12 = vpop.permute.xlu1 %692 }
 0x2b6   : > { %713 = vmatpush.msrb.mxu1 %v693_v12  ;;  %v973_v12 = vld [vmem:[#allocation15 + $0x10] sm:$0xff] }
 0x2b7   : > { %996 = vmatpush.msra.mxu2 %v973_v12 }
 0x2b8   : > { %907 = vmatpush.msra.mxu1 %v887_v13  ;;  %v1338_v14 = vpop.eup %1337  ;;  %v688_v26 = vpop.permute.xlu0 %687  ;;  %v972_v13 = vld [vmem:[#allocation15 + $0x8] sm:$0xff] }
 0x2b9   : > { %1194 = vmatmul.msk.f32.vlgmr.msrb.gmra.mxu1 %vm543_vm1, %v1338_v14  ;;  %v679_v15 = vsel %vm543_vm1, %v1338_v14, 0.0  ;;  %v971_v14 = vld [vmem:[#allocation15] sm:$0xff]  ;;  %997 = vmatpush.msra.mxu2 %v972_v13 }
 0x2ba   : > { %680 = vadd.xlane.f32.xlu2 %v679_v15 }
 0x2bb   : > { %998 = vmatpush.msra.mxu2 %v971_v14 }
 0x2c3   : > { %v866_v16 = vpop.permute.xlu1 %865 }
 0x2c4   : > { %v868_v17 = vsub.f32 %v1880_v44, %v866_v16 }
 0x2c6   : > { %v869_v18 = vmul.f32 1.442695, %v868_v17 }
 0x2c8   : > { %1339 = vpow2.f32 %v869_v18 }
 0x2c9   : > { %1341 = vpow2.f32 %v764_v27 }
 0x2cb   : > { %v599_v20 = vpop.permute.xlu1 %598 }
 0x2cc   : > { %v601_v22 = vmul.f32 %v599_v20, %v595_v19 }
 0x2ce   : > { %v1340_v21 = vpop.eup %1339 }
 0x2cf   : > { %v622_v23 = vpop.f32.mrf.mxu3  ;;  %1200 = vmatmul.msk.f32.vlgmr.msra.gmra.mxu1 %vm543_vm1, %v1340_v21  ;;  %v874_v24 = vsel %vm543_vm1, %v1340_v21, 0.0  ;;  %v1342_v32 = vpop.eup %1341 }
 0x2d0   : > { %v625_v25 = vadd.f32 %v622_v23, %v601_v22  ;;  %875 = vadd.xlane.f32.xlu1 %v874_v24  ;;  %v776_v34 = vmul.f32 %v1342_v32, %v775_v33 }
 0x2d2   : > { %626 = vst.msk [vmem:[#allocation5] sm:$0xff] %vm543_vm1, %v625_v25  ;;  %v1328_v25 = vld [vmem:[%s1978_s6] ss:$0 sm:$0xff] }
 0x2d9   : > { %v684_v58 = vld [vmem:[#allocation5] sm:$0xff] }
 0x2da   : > { %v690_v59 = vmul.f32 %v688_v26, %v684_v58 }
 0x2e3   : > { %v591_v30 = vpop.xlane.xlu0 %590 }
 0x2e4   : > { %v592_v31 = vadd.f32 %v591_v30, %v588_v29 }
 0x2e6   : > { %594 = vst.msk [vmem:[#allocation4] sm:$0xff] %vm432_vm3, %v592_v31 }
 0x2e9   : > { %785 = vperm.xlu1 %1326, %v1342_v32  }
 0x2ed   : > { %v923_v46 = vld [vmem:[#allocation4] sm:$0xff] }
 0x323   : > { %v779_v35 = vpop.xlane.xlu1 %778 }
 0x324   : > { %v780_v36 = vadd.f32 %v779_v35, %v776_v34 }
 0x326   : > { %781 = vst.msk [vmem:[#allocation4 + $0x10] sm:$0xff] %vm432_vm3, %v780_v36 }
 0x32d   : > { %v681_v39 = vpop.xlane.xlu2 %680  ;;  %v947_v40 = vld [vmem:[#allocation4 + $0x10] sm:$0xff] }
 0x32e   : > { %v682_v41 = vadd.f32 %v681_v39, %v678_v38  ;;  %1343 = vrcp.f32 %v947_v40 }
 0x32f   : > { %1345 = vpow2.f32 %v861_v42 }
 0x330   : > { %683 = vst.msk [vmem:[#allocation4 + $0x8] sm:$0xff] %vm432_vm3, %v682_v41  ;;  %1347 = vrcp.f32 %v923_v46 }
 0x332   : > { %v812_v43 = vpop.f32.mrf.mxu3 }
 0x333   : > { %816 = vrot.lane.b32.xlu0 %v812_v43, %s1645_s18 }
 0x334   : > { %v1344_v44 = vpop.eup %1343 }
 0x335   : > { %952 = vperm.xlu1 %1326, %v1344_v44   ;;  %v1346_v47 = vpop.eup %1345 }
 0x336   : > { %v715_v45 = vpop.f32.mrf.mxu1  ;;  %v1348_v49 = vpop.eup %1347  ;;  %v873_v50 = vmul.f32 %v1346_v47, %v872_v48 }
 0x337   : > { %719 = vrot.lane.b32.xlu2 %v715_v45, %s1646_s8  ;;  %v935_v53 = vld [vmem:[#allocation4 + $0x8] sm:$0xff] }
 0x338   : > { %1349 = vrcp.f32 %v935_v53 }
 0x33b   : > { %882 = vperm.xlu0 %1325, %v1346_v47  }
 0x33e   : > { %v1350_v56 = vpop.eup %1349 }
 0x343   : > { %v876_v51 = vpop.xlane.xlu1 %875  ;;  %928 = vperm.xlu0 %1325, %v1348_v49  }
 0x344   : > { %v877_v52 = vadd.f32 %v876_v51, %v873_v50 }
 0x346   : > { %878 = vst.msk [vmem:[#allocation4 + $0x18] sm:$0xff] %vm432_vm3, %v877_v52 }
 0x34c   : > { %v909_v54 = vpop.f32.mrf.mxu1 }
 0x34d   : > { %913 = vrot.lane.b32.xlu2 %v909_v54, %s1647_s12  ;;  %v959_v55 = vld [vmem:[#allocation4 + $0x18] sm:$0xff] }
 0x34e   : > { %1351 = vrcp.f32 %v959_v55 }
 0x354   : > { %v1352_v57 = vpop.eup %1351 }
 0x355   : > { %940 = vperm.xlu2 %1327, %v1350_v56   ;;  %964 = vperm.xlu0 %1325, %v1352_v57  }
 0x35b   : > { %v786_v63 = vpop.permute.xlu1 %785 }
 0x391   : > { %v720_v60 = vpop.permute.xlu2 %719 }
 0x392   : > { %v722_v61 = vadd.f32 %v720_v60, %v690_v59 }
 0x394   : > { %724 = vst.msk [vmem:[#allocation5] sm:$0xff] %vm723_vm4, %v722_v61 }
 0x39b   : > { %v782_v62 = vld [vmem:[#allocation5] sm:$0xff] }
 0x39c   : > { %v788_v0 = vmul.f32 %v786_v63, %v782_v62 }
 0x3a5   : > { %v817_v1 = vpop.permute.xlu0 %816 }
 0x3a6   : > { %v819_v2 = vadd.f32 %v817_v1, %v788_v0 }
 0x3a7   : > { %v914_v6 = vpop.permute.xlu2 %913  ;;  %v953_v18 = vpop.permute.xlu1 %952 }
 0x3a8   : > { %821 = vst.msk [vmem:[#allocation5] sm:$0xff] %vm820_vm5, %v819_v2 }
 0x3ad   : > { %v883_v3 = vpop.permute.xlu0 %882 }
 0x3af   : > { %v879_v4 = vld [vmem:[#allocation5] sm:$0xff]  ;;  %v941_v15 = vpop.permute.xlu2 %940 }
 0x3b0   : > { %v885_v5 = vmul.f32 %v883_v3, %v879_v4 }
 0x3b2   : > { %v916_v7 = vadd.f32 %v914_v6, %v885_v5 }
 0x3b4   : > { %918 = vst.msk [vmem:[#allocation5] sm:$0xff] %vm917_vm6, %v916_v7 }
 0x3b5   : > { %v929_v9 = vpop.permute.xlu0 %928 }
 0x3bb   : > { %v925_v8 = vld [vmem:[#allocation5] sm:$0xff] }
 0x3bc   : > { %v931_v10 = vmul.f32 %v929_v9, %v925_v8 }
 0x3be   : > { %933 = vst.msk [vmem:[#allocation5] sm:$0xff] %vm543_vm1, %v931_v10 }
 0x3c5   : > { %v937_v16 = vld [vmem:[#allocation5] sm:$0xff] }
 0x3c6   : > { %v943_v17 = vmul.f32 %v941_v15, %v937_v16 }
 0x3c7   : > { %v965_v22 = vpop.permute.xlu0 %964 }
 0x3c8   : > { %945 = vst.msk [vmem:[#allocation5] sm:$0xff] %vm723_vm4, %v943_v17 }
 0x3cf   : > { %v949_v19 = vld [vmem:[#allocation5] sm:$0xff] }
 0x3d0   : > { %v955_v20 = vmul.f32 %v953_v18, %v949_v19 }
 0x3d2   : > { %957 = vst.msk [vmem:[#allocation5] sm:$0xff] %vm820_vm5, %v955_v20 }
 0x3d9   : > { %v961_v21 = vld [vmem:[#allocation5] sm:$0xff] }
 0x3da   : > { %v967_v23 = vmul.f32 %v965_v22, %v961_v21 }
 0x3dc   : > { %969 = vst.msk [vmem:[#allocation5] sm:$0xff] %vm917_vm6, %v967_v23 }
 0x3e3   : > { %v970_v24 = vld [vmem:[#allocation5] sm:$0xff] }
 0x3e4   : > { %1201 = vmatmul.msk.f32.vlgmr.msra.gmra.mxu2 %vm441_vm0, %v970_v24 }
 0x467   : > { %v1000_v26 = vpop.f32.mrf.mxu2 }
 0x468   : > { %v1001_v27 = vadd.f32 %v1328_v25, %v1000_v26 }
 0x46a   : > { %1003 = vst.msk [vmem:[%s427_s22] sm:$0xff] %vm441_vm0, %v1001_v27 }
 0x46b   : > { %1560 = shalt.err (!%p1557_p13)
}
 0x46c   : > { %1226 = dma.vmem_to_hbm [thread:$0]  (%p1780_p2), %s1019_s15, 128, %s1021_s3, %s1005_s4  }
 0x46d PF: > { %s1032_s2 = sand.u32 1, %s1611_s24   ;;  %p1249_p0 = pnand %p1173_p6, %p1787_p5 }
 0x46e   : > { %s1033_s21 = scalar_lea.sflag [#allocation8], %s1032_s2 }
 0x46f   : > { %p1250_p4 = pneg %p1249_p0 }
 0x471   : > { %1606 = dma.done.wait (%p1250_p4), %s1033_s21, 128  }
 0x472   : > { %1608 = vsyncadd (%p1250_p4), %s1033_s21, 4294967168  ;;  %s28_s29 = sadd.s32 1, %s1631_s29   ;;  %s2001_s18 = sld [smem:[#allocation24_spill]] }
 0x473   : > { %p25_p7 = scmp.ge.s32.totalorder %s28_s29, 4   ;;  %s2002_s26 = sld [smem:[#allocation27_spill]] }
 0x474   : > { %s2003_s27 = sld [smem:[#allocation25_spill]]  ;;  %s2005_s24 = smov %s1615_s25 }
 0x475   : > { %s2004_s28 = sld [smem:[#allocation26_spill]]  ;;  %27 = sbr.rel (!%p25_p7) target bundleno = 15 (0xf), region = 143 }
 0x478   : > { %s2006_s25 = smov %s2001_s18 }
 0x47a   :  { %1039 = vsyncpa [#allocation7], 1 }
 0x47b   :  { %1041 = vsyncpa [#allocation7 + $0x1], 1 }
 0x47c   :  { %1042 = vsyncpa [#allocation10], 1 }
 0x47d   :  { %1044 = vsyncpa [#allocation10 + $0x1], 1 }
 0x47e   :  { %1045 = vsyncpa [#allocation13], 1 }
 0x47f   :  { %1046 = vsyncpa [#allocation16], 1 }
 0x480   :  { %1047 = vsyncpa [#allocation8], 1 }
 0x481   :  { %1049 = vsyncpa [#allocation8 + $0x1], 1 }

</bundles_post_ra>
